<compile_context>
chip_gen: v7x
topology: tpu7x:2x2x1
jax: 0.10.0
libtpu: 0.0.40
codegen_flags: <defaults>
</compile_context>

<pallas_src>
import jax
import jax.numpy as jnp
from jax.experimental import pallas as pl
from jax.experimental.pallas import tpu as pltpu

D_MODEL = 64
N_HEAD = 8
HEAD_DIM = D_MODEL // N_HEAD   # 8
SEQ_LEN = 16
BATCH = 2


def _attn_kernel(x_ref, wqkv_ref, bqkv_ref, wo_ref, bo_ref,
                 bias_ref, hmask_ref, o_ref, pv_ref):
    bb, S, D = x_ref.shape
    H = N_HEAD
    R = bb * S                                   # activation rows this grid step

    x = x_ref[...].reshape(R, D)                 # fold batch into the sublane dim

    # ---- fused QKV projection: one MXU matmul (q-scale pre-folded into wqkv) ----
    qkv = jnp.dot(x, wqkv_ref[...], preferred_element_type=jnp.float32) + bqkv_ref[...]
    q = qkv[:, :D]
    k = qkv[:, D:2 * D]
    v = qkv[:, 2 * D:]

    # ---- all-head / all-batch scores as ONE lane-dense (R, H*R) slab ------------
    # Slab column j encodes (head, batch, key).  hmask zeroes the channels that
    # belong to other heads, so a single 64-deep contraction against Q yields every
    # head's Q_h K_h^T side by side along the lanes.
    k_blk = jnp.concatenate([k] * H, axis=0) * hmask_ref[...]            # (H*R, D)
    scores = jax.lax.dot_general(q, k_blk, (((1,), (1,)), ((), ())),
                                 preferred_element_type=jnp.float32)     # (R, H*R)
    scores = scores + bias_ref[...]              # hoisted causal(+batch) 0/-1e30 bias

    # Softmax.  The per-row max is taken over the whole slab; this is exact while
    # each head's max score stays within f32-exp range of the slab max (always true
    # for this module/data; a per-head max would need extra XLU segment reductions).
    m = jnp.max(scores, axis=-1, keepdims=True)
    p = jnp.exp(scores - m)

    # ---- PV and per-head softmax denominators in ONE (R,H*R)@(H*R,2D) matmul ----
    #   lanes [0, D)  : block-diagonal V   -> unnormalized per-head attention output
    #   lanes [D, 2D) : head selector (1s) -> per-head sum_k exp, already broadcast
    #                                          over each head's HD output lanes
    pv_ref[:, :D] = jnp.concatenate([v] * H, axis=0) * hmask_ref[...]
    pv_ref[:, D:] = hmask_ref[...]
    ov = jnp.dot(p, pv_ref[...], preferred_element_type=jnp.float32)     # (R, 2D)

    den = ov[:, D:]
    inv = pl.reciprocal(den, approx=True)        # EUP slot (otherwise only exp uses it)
    inv = inv * (2.0 - den * inv)                # one Newton step -> ~f32-exact
    attn = ov[:, :D] * inv

    # ---- output projection -------------------------------------------------------
    y = jnp.dot(attn, wo_ref[...], preferred_element_type=jnp.float32) + bo_ref[...]
    # TODO(synk): residual dropout (p=0.1) is identity in eval mode; omitted here.
    o_ref[...] = y.reshape(bb, S, D).astype(o_ref.dtype)


def causal_self_attention(x, params):
    """x: (B, S, D) float32; params: (D, D) weights in (in, out) layout, (1, D) biases."""
    B, S, D = x.shape
    H = N_HEAD
    HD = D // H
    scale = HD ** (-0.5)

    # ---- one-time parameter prep: fuse QKV and fold the query scale into Wq/bq ----
    wqkv = jnp.concatenate([params["wq"] * scale, params["wk"], params["wv"]], axis=1)
    bqkv = jnp.concatenate([params["bq"] * scale, params["bk"], params["bv"]], axis=1)

    # ---- chip-aware batch blocking ------------------------------------------------
    # Single-TC chips (v2..v6e): fold the whole batch into one grid step.
    # Dual-TC v7x (or unknown): keep a "parallel" batch axis so both cores get work.
    kind = ""
    try:
        kind = jax.devices()[0].device_kind.lower()
    except Exception:
        pass
    single_tc = any(t in kind for t in ("v2", "v3", "v4", "v5", "v6"))
    bb = B if single_tc else 1
    grid = (B // bb,)

    R = bb * S          # activation rows per grid step
    C = H * R           # score-slab lanes / PV rows per grid step

    # ---- hoisted static structure (built once, streamed as constant-index blocks) --
    # Slab column / PV row j encodes (head, batch, key): j = head*R + batch*S + key.
    col = jnp.arange(C)
    ch = col // R                                   # head of slab column / pv row
    cb = (col % R) // S                             # batch (within block) of column
    ck = col % S                                    # key position of column
    row = jnp.arange(R)
    rb = row // S                                   # batch (within block) of act. row
    rq = row % S                                    # query position of act. row

    keep = (cb[None, :] == rb[:, None]) & (ck[None, :] <= rq[:, None])
    bias = jnp.where(keep, 0.0, -1e30).astype(jnp.float32)                        # (R, C)
    hmask = (ch[:, None] == (jnp.arange(D)[None, :] // HD)).astype(jnp.float32)   # (C, D)

    def replicated(shape):
        return pl.BlockSpec(shape, lambda b: (0,) * len(shape))

    return pl.pallas_call(
        _attn_kernel,
        out_shape=jax.ShapeDtypeStruct((B, S, D), x.dtype),
        grid_spec=pltpu.PrefetchScalarGridSpec(
            num_scalar_prefetch=0,
            grid=grid,
            in_specs=[
                pl.BlockSpec((bb, S, D), lambda b: (b, 0, 0)),   # x
                replicated((D, 3 * D)),                          # fused Wqkv (q-scaled)
                replicated((1, 3 * D)),                          # fused bqkv
                replicated((D, D)),                              # Wo
                replicated((1, D)),                              # bo
                replicated((R, C)),                              # causal/batch bias
                replicated((C, D)),                              # head block-diag selector
            ],
            out_specs=pl.BlockSpec((bb, S, D), lambda b: (b, 0, 0)),
            scratch_shapes=[pltpu.VMEM((C, 2 * D), jnp.float32)],   # persistent PV operand
        ),
        compiler_params=pltpu.CompilerParams(
            dimension_semantics=("parallel",)),
    )(x, wqkv, bqkv, params["wo"], params["bo"], bias, hmask)


def _reference(x, params):
    """Pure-JAX reference mirroring the PyTorch forward (dropout in eval = identity)."""
    B, S, D = x.shape
    q = x @ params["wq"] + params["bq"]
    k = x @ params["wk"] + params["bk"]
    v = x @ params["wv"] + params["bv"]

    def split(t):
        return t.reshape(B, S, N_HEAD, HEAD_DIM).transpose(0, 2, 1, 3)

    q, k, v = split(q), split(k), split(v)
    scale = HEAD_DIM ** (-0.5)
    scores = jnp.einsum("bhqd,bhkd->bhqk", q, k) * scale
    mask = jnp.tril(jnp.ones((S, S), dtype=bool))
    scores = jnp.where(mask, scores, -jnp.inf)
    w = jax.nn.softmax(scores, axis=-1)
    out = jnp.einsum("bhqk,bhkd->bhqd", w, v)
    out = out.transpose(0, 2, 1, 3).reshape(B, S, D)
    return out @ params["wo"] + params["bo"]


if __name__ == "__main__":
    key = jax.random.PRNGKey(0)
    ks = jax.random.split(key, 9)
    scale = 1.0 / jnp.sqrt(D_MODEL)
    params = {
        # weights stored as (in, out) so the kernel computes x @ W + b
        "wq": jax.random.normal(ks[0], (D_MODEL, D_MODEL), jnp.float32) * scale,
        "wk": jax.random.normal(ks[1], (D_MODEL, D_MODEL), jnp.float32) * scale,
        "wv": jax.random.normal(ks[2], (D_MODEL, D_MODEL), jnp.float32) * scale,
        "wo": jax.random.normal(ks[3], (D_MODEL, D_MODEL), jnp.float32) * scale,
        "bq": jax.random.normal(ks[4], (1, D_MODEL), jnp.float32) * 0.02,
        "bk": jax.random.normal(ks[5], (1, D_MODEL), jnp.float32) * 0.02,
        "bv": jax.random.normal(ks[6], (1, D_MODEL), jnp.float32) * 0.02,
        "bo": jax.random.normal(ks[7], (1, D_MODEL), jnp.float32) * 0.02,
    }
    x = jax.random.normal(ks[8], (BATCH, SEQ_LEN, D_MODEL), jnp.float32)

    out = causal_self_attention(x, params)
    out = jax.block_until_ready(out)

    ref = _reference(x, params)
    assert out.shape == (BATCH, SEQ_LEN, D_MODEL)
    assert jnp.allclose(out, ref, atol=1e-4, rtol=1e-4), "mismatch vs reference"
    print("KERNEL_OK")
</pallas_src>

<mosaic_0001>
module attributes {stable_mosaic.version = 11 : i64} {
  func.func @_attn_kernel(%arg0: i32, %arg1: memref<1x16x64xf32, #tpu.memory_space<vmem>>, %arg2: memref<64x192xf32, #tpu.memory_space<vmem>>, %arg3: memref<1x192xf32, #tpu.memory_space<vmem>>, %arg4: memref<64x64xf32, #tpu.memory_space<vmem>>, %arg5: memref<1x64xf32, #tpu.memory_space<vmem>>, %arg6: memref<16x128xf32, #tpu.memory_space<vmem>>, %arg7: memref<128x64xf32, #tpu.memory_space<vmem>>, %arg8: memref<1x16x64xf32, #tpu.memory_space<vmem>>, %arg9: memref<128x128xf32, #tpu.memory_space<vmem>>) attributes {dimension_semantics = [#tpu.dimension_semantics<parallel>], iteration_bounds = array<i64: 2>, scalar_prefetch = 0 : i64, scratch_operands = 1 : i64, tpu.core_type = #tpu.core_type<tc>, window_params = [{transform_indices = @transform_0, window_bounds = array<i64: 1, 16, 64>}, {pipeline_mode = #tpu.pipeline_mode<synchronous>, transform_indices = @transform_1, window_bounds = array<i64: 64, 192>}, {pipeline_mode = #tpu.pipeline_mode<synchronous>, transform_indices = @transform_2, window_bounds = array<i64: 1, 192>}, {pipeline_mode = #tpu.pipeline_mode<synchronous>, transform_indices = @transform_3, window_bounds = array<i64: 64, 64>}, {pipeline_mode = #tpu.pipeline_mode<synchronous>, transform_indices = @transform_4, window_bounds = array<i64: 1, 64>}, {pipeline_mode = #tpu.pipeline_mode<synchronous>, transform_indices = @transform_5, window_bounds = array<i64: 16, 128>}, {pipeline_mode = #tpu.pipeline_mode<synchronous>, transform_indices = @transform_6, window_bounds = array<i64: 128, 64>}, {transform_indices = @transform_7, window_bounds = array<i64: 1, 16, 64>}]} {
    %c0 = arith.constant 0 : index
    %c0_0 = arith.constant 0 : index
    %c0_1 = arith.constant 0 : index
    %0 = vector.load %arg1[%c0, %c0_0, %c0_1] : memref<1x16x64xf32, #tpu.memory_space<vmem>>, vector<1x16x64xf32>
    %1 = vector.shape_cast %0 : vector<1x16x64xf32> to vector<16x64xf32>
    %c0_2 = arith.constant 0 : index
    %c0_3 = arith.constant 0 : index
    %2 = vector.load %arg2[%c0_2, %c0_3] : memref<64x192xf32, #tpu.memory_space<vmem>>, vector<64x192xf32>
    %cst = arith.constant dense<0.000000e+00> : vector<16x192xf32>
    %3 = tpu.matmul %1, %2, %cst {dimension_numbers = #tpu.dot_dimension_numbers<[1], [0], [0], [1], [0, 0, 1, 1], [], []>} : vector<16x64xf32>, vector<64x192xf32>, vector<16x192xf32> -> vector<16x192xf32>
    %c0_4 = arith.constant 0 : index
    %c0_5 = arith.constant 0 : index
    %4 = vector.load %arg3[%c0_4, %c0_5] : memref<1x192xf32, #tpu.memory_space<vmem>>, vector<1x192xf32>
    %5 = vector.broadcast %4 : vector<1x192xf32> to vector<16x192xf32>
    %6 = arith.addf %3, %5 : vector<16x192xf32>
    %7 = vector.extract_strided_slice %6 {offsets = [0, 0], sizes = [16, 64], strides = [1, 1]} : vector<16x192xf32> to vector<16x64xf32>
    %8 = vector.extract_strided_slice %6 {offsets = [0, 64], sizes = [16, 64], strides = [1, 1]} : vector<16x192xf32> to vector<16x64xf32>
    %9 = vector.extract_strided_slice %6 {offsets = [0, 128], sizes = [16, 64], strides = [1, 1]} : vector<16x192xf32> to vector<16x64xf32>
    %10 = tpu.concatenate %8, %8, %8, %8, %8, %8, %8, %8 in 0 : vector<16x64xf32>, vector<16x64xf32>, vector<16x64xf32>, vector<16x64xf32>, vector<16x64xf32>, vector<16x64xf32>, vector<16x64xf32>, vector<16x64xf32> -> vector<128x64xf32>
    %c0_6 = arith.constant 0 : index
    %c0_7 = arith.constant 0 : index
    %11 = vector.load %arg7[%c0_6, %c0_7] : memref<128x64xf32, #tpu.memory_space<vmem>>, vector<128x64xf32>
    %12 = arith.mulf %10, %11 : vector<128x64xf32>
    %cst_8 = arith.constant dense<0.000000e+00> : vector<16x128xf32>
    %13 = tpu.matmul %7, %12, %cst_8 {dimension_numbers = #tpu.dot_dimension_numbers<[1], [1], [0], [0], [0, 0, 1, 0], [], []>} : vector<16x64xf32>, vector<128x64xf32>, vector<16x128xf32> -> vector<16x128xf32>
    %c0_9 = arith.constant 0 : index
    %c0_10 = arith.constant 0 : index
    %14 = vector.load %arg6[%c0_9, %c0_10] : memref<16x128xf32, #tpu.memory_space<vmem>>, vector<16x128xf32>
    %15 = arith.addf %13, %14 : vector<16x128xf32>
    %cst_11 = arith.constant dense<0xFF800000> : vector<16xf32>
    %16 = vector.multi_reduction <maximumf>, %15, %cst_11 [1] : vector<16x128xf32> to vector<16xf32>
    %17 = vector.shape_cast %16 : vector<16xf32> to vector<16x1xf32>
    %18 = vector.broadcast %17 : vector<16x1xf32> to vector<16x128xf32>
    %19 = arith.subf %15, %18 : vector<16x128xf32>
    %20 = math.exp %19 : vector<16x128xf32>
    %21 = tpu.concatenate %9, %9, %9, %9, %9, %9, %9, %9 in 0 : vector<16x64xf32>, vector<16x64xf32>, vector<16x64xf32>, vector<16x64xf32>, vector<16x64xf32>, vector<16x64xf32>, vector<16x64xf32>, vector<16x64xf32> -> vector<128x64xf32>
    %c0_12 = arith.constant 0 : index
    %c0_13 = arith.constant 0 : index
    %22 = vector.load %arg7[%c0_12, %c0_13] : memref<128x64xf32, #tpu.memory_space<vmem>>, vector<128x64xf32>
    %23 = arith.mulf %21, %22 : vector<128x64xf32>
    %c0_14 = arith.constant 0 : index
    %c0_15 = arith.constant 0 : index
    %24 = vector.load %arg9[%c0_14, %c0_15] : memref<128x128xf32, #tpu.memory_space<vmem>>, vector<128x64xf32>
    tpu.vector_store %arg9[%c0_14, %c0_15], %23 {strides = array<i32>} : memref<128x128xf32, #tpu.memory_space<vmem>>, vector<128x64xf32>,
    %c0_16 = arith.constant 0 : index
    %c0_17 = arith.constant 0 : index
    %25 = vector.load %arg7[%c0_16, %c0_17] : memref<128x64xf32, #tpu.memory_space<vmem>>, vector<128x64xf32>
    %c0_18 = arith.constant 0 : index
    %c64 = arith.constant 64 : index
    %26 = vector.load %arg9[%c0_18, %c64] : memref<128x128xf32, #tpu.memory_space<vmem>>, vector<128x64xf32>
    tpu.vector_store %arg9[%c0_18, %c64], %25 {strides = array<i32>} : memref<128x128xf32, #tpu.memory_space<vmem>>, vector<128x64xf32>,
    %c0_19 = arith.constant 0 : index
    %c0_20 = arith.constant 0 : index
    %27 = vector.load %arg9[%c0_19, %c0_20] : memref<128x128xf32, #tpu.memory_space<vmem>>, vector<128x128xf32>
    %cst_21 = arith.constant dense<0.000000e+00> : vector<16x128xf32>
    %28 = tpu.matmul %20, %27, %cst_21 {dimension_numbers = #tpu.dot_dimension_numbers<[1], [0], [0], [1], [0, 0, 1, 1], [], []>} : vector<16x128xf32>, vector<128x128xf32>, vector<16x128xf32> -> vector<16x128xf32>
    %29 = vector.extract_strided_slice %28 {offsets = [0, 64], sizes = [16, 64], strides = [1, 1]} : vector<16x128xf32> to vector<16x64xf32>
    %30 = tpu.reciprocal %29 {approx = true} : vector<16x64xf32> -> vector<16x64xf32>
    %31 = arith.mulf %29, %30 : vector<16x64xf32>
    %cst_22 = arith.constant 2.000000e+00 : f32
    %32 = vector.broadcast %cst_22 : f32 to vector<16x64xf32>
    %33 = arith.subf %32, %31 : vector<16x64xf32>
    %34 = arith.mulf %30, %33 : vector<16x64xf32>
    %35 = vector.extract_strided_slice %28 {offsets = [0, 0], sizes = [16, 64], strides = [1, 1]} : vector<16x128xf32> to vector<16x64xf32>
    %36 = arith.mulf %35, %34 : vector<16x64xf32>
    %c0_23 = arith.constant 0 : index
    %c0_24 = arith.constant 0 : index
    %37 = vector.load %arg4[%c0_23, %c0_24] : memref<64x64xf32, #tpu.memory_space<vmem>>, vector<64x64xf32>
    %cst_25 = arith.constant dense<0.000000e+00> : vector<16x64xf32>
    %38 = tpu.matmul %36, %37, %cst_25 {dimension_numbers = #tpu.dot_dimension_numbers<[1], [0], [0], [1], [0, 0, 1, 1], [], []>} : vector<16x64xf32>, vector<64x64xf32>, vector<16x64xf32> -> vector<16x64xf32>
    %c0_26 = arith.constant 0 : index
    %c0_27 = arith.constant 0 : index
    %39 = vector.load %arg5[%c0_26, %c0_27] : memref<1x64xf32, #tpu.memory_space<vmem>>, vector<1x64xf32>
    %40 = vector.broadcast %39 : vector<1x64xf32> to vector<16x64xf32>
    %41 = arith.addf %38, %40 : vector<16x64xf32>
    %42 = vector.shape_cast %41 : vector<16x64xf32> to vector<1x16x64xf32>
    %c0_28 = arith.constant 0 : index
    %c0_29 = arith.constant 0 : index
    %c0_30 = arith.constant 0 : index
    %43 = vector.load %arg8[%c0_28, %c0_29, %c0_30] : memref<1x16x64xf32, #tpu.memory_space<vmem>>, vector<1x16x64xf32>
    tpu.vector_store %arg8[%c0_28, %c0_29, %c0_30], %42 {strides = array<i32>} : memref<1x16x64xf32, #tpu.memory_space<vmem>>, vector<1x16x64xf32>,
    return
  }
  func.func @transform_0(%arg0: i32) -> (i32, i32, i32) {
    %c0_i32 = arith.constant 0 : i32
    %c0_i32_0 = arith.constant 0 : i32
    %c0_i32_1 = arith.constant 0 : i32
    return %arg0, %c0_i32, %c0_i32_0 : i32, i32, i32
  }
  func.func @transform_1(%arg0: i32) -> (i32, i32) {
    %c0_i32 = arith.constant 0 : i32
    %c0_i32_0 = arith.constant 0 : i32
    %c0_i32_1 = arith.constant 0 : i32
    return %c0_i32, %c0_i32_0 : i32, i32
  }
  func.func @transform_2(%arg0: i32) -> (i32, i32) {
    %c0_i32 = arith.constant 0 : i32
    %c0_i32_0 = arith.constant 0 : i32
    %c0_i32_1 = arith.constant 0 : i32
    return %c0_i32, %c0_i32_0 : i32, i32
  }
  func.func @transform_3(%arg0: i32) -> (i32, i32) {
    %c0_i32 = arith.constant 0 : i32
    %c0_i32_0 = arith.constant 0 : i32
    %c0_i32_1 = arith.constant 0 : i32
    return %c0_i32, %c0_i32_0 : i32, i32
  }
  func.func @transform_4(%arg0: i32) -> (i32, i32) {
    %c0_i32 = arith.constant 0 : i32
    %c0_i32_0 = arith.constant 0 : i32
    %c0_i32_1 = arith.constant 0 : i32
    return %c0_i32, %c0_i32_0 : i32, i32
  }
  func.func @transform_5(%arg0: i32) -> (i32, i32) {
    %c0_i32 = arith.constant 0 : i32
    %c0_i32_0 = arith.constant 0 : i32
    %c0_i32_1 = arith.constant 0 : i32
    return %c0_i32, %c0_i32_0 : i32, i32
  }
  func.func @transform_6(%arg0: i32) -> (i32, i32) {
    %c0_i32 = arith.constant 0 : i32
    %c0_i32_0 = arith.constant 0 : i32
    %c0_i32_1 = arith.constant 0 : i32
    return %c0_i32, %c0_i32_0 : i32, i32
  }
  func.func @transform_7(%arg0: i32) -> (i32, i32, i32) {
    %c0_i32 = arith.constant 0 : i32
    %c0_i32_0 = arith.constant 0 : i32
    %c0_i32_1 = arith.constant 0 : i32
    return %arg0, %c0_i32, %c0_i32_0 : i32, i32, i32
  }
}

</mosaic_0001>

<bundles_post_ra>
// kernel: tpu_custom_call.1
= control target key start
LH: loop header
LB: loop body
LE: loop exit
PB: predicated region body
PF: predicated region fallthrough
CT: control target
= control target key end

     0   :  { %12 = vsyncpa [#allocation4], 0  ;;  %s2264_s0 = inlined_call_operand.hbm [shape: f32[2,16,64], index: 0, kind: input, shape index: {}]   ;;  %s2265_s1 = inlined_call_operand.vmem [shape: f32[64,192], index: 1, kind: input, shape index: {}]   ;;  %s2266_s2 = inlined_call_operand.vmem [shape: f32[1,192], index: 2, kind: input, shape index: {}]   ;;  %s2267_s3 = inlined_call_operand.vmem [shape: f32[64,64], index: 3, kind: input, shape index: {}]   ;;  %s2268_s4 = inlined_call_operand.hbm [shape: f32[1,64], index: 4, kind: input, shape index: {}]   ;;  %s2269_s5 = inlined_call_operand.vmem [shape: f32[16,128], index: 5, kind: input, shape index: {}]   ;;  %s2270_s6 = inlined_call_operand.vmem [shape: f32[128,64], index: 6, kind: input, shape index: {}]   ;;  %s2271_s7 = inlined_call_operand.hbm [shape: f32[2,16,64], index: 7, kind: output, shape index: {}]  }
   0x1   :  { %14 = vsyncpa [#allocation4 + $0x1], 0 }
   0x2   :  { %15 = vsyncpa [#allocation7], 0 }
   0x3   :  { %16 = vsyncpa [#allocation5], 0 }
   0x4   :  { %18 = vsyncpa [#allocation5 + $0x1], 0  ;;  %s1704_s24 = smov 0   ;;  %s1706_s25 = smov 0  }
   0x5   :  { %s1708_s26 = smov 0   ;;  %s1710_s27 = smov 0  }
   0x6 LB: > { %2280 = sst [smem:[#allocation12_spill]] %s1649_s26  ;;  %s1725_s28 = sadd.s32 4294967295, %s1653_s27   ;;  %s1653_s27 = sphi %s1710_s27, %s2301_s27   ;;  %s1649_s26 = sphi %s1708_s26, %s2303_s26   ;;  %s1645_s25 = sphi %s1706_s25, %s2305_s25   ;;  %s1641_s24 = sphi %s1704_s24, %s2304_s24  }
   0x7   : > { %s1126_s29 = sadd.s32 4294967294, %s1653_s27   ;;  %s1729_s30 = sadd.s32 1, %s1653_s27  }
   0x8   : > { %2281 = sst [smem:[#allocation13_spill]] %s1729_s30  ;;  %s31_s8 = sadd.s32 1, %s1649_s26 }
   0x9   : > { %s28_s9 = ssub.s32 %s1653_s27, %s1729_s30  ;;  %p38_p0 = scmp.ne.s32.totalorder %s1649_s26, %s1645_s25 }
   0xa   : > { %p29_p1 = scmp.eq.s32.totalorder %s28_s9, 0  ;;  %p39_p2 = scmp.eq.s32.totalorder %s1653_s27, 0 }
   0xb   : > { %p44_p3 = scmp.ne.s32.totalorder %s1645_s25, %s1641_s24  ;;  %p2272_p4 = scmp.eq.s32.totalorder %s1725_s28, 0 }
   0xc   : > { %s1741_s10 = scalar_select %p29_p1, %s1649_s26, %s31_s8  }
   0xd   : > { %p1743_p5 = por %p39_p2, %p38_p0  ;;  %p1749_p6 = por %p2272_p4, %p44_p3 }
   0xe   : > { %2282 = sst [smem:[#allocation14_spill]] %s1741_s10  ;;  %p194_p7 = scmp.eq.s32.totalorder %s1725_s28, 1 }
   0xf   : > { %s2284_s12 = scalar_select %p1749_p6, 1, 0 }
  0x10   : > { %p200_p8 = scmp.eq.s32.totalorder %s1126_s29, 1  ;;  %p1127_p9 = scmp.ge.s32.totalorder %s1653_s27, 1 }
  0x11   : > { %p207_p10 = scmp.lt.s32.totalorder %s1653_s27, 3  ;;  %p1756_p11 = por %p194_p7, %p38_p0 }
  0x12   : > { %p1760_p12 = por %p200_p8, %p44_p3  ;;  %s1655_s16 = smov [#allocation6]  }
  0x13   : > { %s2285_s13 = scalar_select %p1756_p11, 1, 0 }
  0x14   : > { %s2286_s14 = scalar_select %p1760_p12, 1, 0 }
  0x15   : > { %p1764_p13 = pnand %p1127_p9, %p207_p10  ;;  %s229_s17 = sshll.u32 %s1655_s16, 4  ;;  %s230_s17 = int_to_ptr.vmem [resolvable:$true] %s229_s17 }
  0x16   : > { %p1435_p4 = scmp.lt.s32.totalorder %s1653_s27, 2  ;;  %p2288_p0 = scmp.eq.s32.totalorder %s1725_s28, 0 }
  0x17   : > { %s2287_s15 = scalar_select %p1764_p13, 1, 0 }
  0x18   : > { %p1422_p2 = pneg %p1764_p13  ;;  %s246_s19 = sand.u32 1, %s1649_s26  }
  0x19   : > { %p1781_p3 = pnand %p1435_p4, %p1743_p5  ;;  %s1130_s21 = sshll.u32 %s246_s19, 4 }
  0x1a   : > { %p1774_p7 = pnand %p1422_p2, %p2288_p0  ;;  %s1525_s29 = scalar_lea.hbm %s2268_s4, 16 }
  0x1b   : > { %s2290_s20 = scalar_select %p1781_p3, 1, 0 }
  0x1c   : > { %p1526_p8 = scmp.ne.s32.totalorder %s2268_s4, %s1525_s29  ;;  %p1527_p9 = pneg %p1774_p7 }
  0x1d   : > { %p1532_p4 = scmp.lt.u32.totalorder %s1525_s29, %s2268_s4 }
  0x1e   : > { %p1528_p10 = pnand %p1527_p9, %p1526_p8 }
  0x20   : > { %p1529_p2 = pneg %p1528_p10 }
  0x22   : > { %p1534_p5 = pnand %p1532_p4, %p1529_p2 }
  0x24   : > { %1537 = shalt.err (!%p1534_p5)
}
  0x25   : > { %s1538_s11 = scalar_lea.vmem %s230_s17, 16  ;;  %s1545_s22 = scalar_lea.vmem %s230_s17, 32 }
  0x26   : > { %p1539_p0 = scmp.ne.s32.totalorder %s230_s17, %s1538_s11  ;;  %p1546_p11 = scmp.lt.s32.totalorder %s230_s17, %s230_s17 }
  0x27   : > { %p1547_p6 = scmp.lt.s32.totalorder %s1545_s22, %s1538_s11 }
  0x28   : > { %p1541_p1 = pnand %p1539_p0, %p1527_p9 }
  0x29   : > { %p1548_p13 = por %p1547_p6, %p1546_p11 }
  0x2a   : > { %p1542_p12 = pneg %p1541_p1 }
  0x2c   : > { %p1549_p3 = pnand %p1548_p13, %p1542_p12 }
  0x2e   : > { %1552 = shalt.err (!%p1549_p3)
}
  0x2f   : > { %1425 = dma.hbm_to_vmem [thread:$0]  (!%p1774_p7), %s2268_s4, 16, %s230_s17, [#allocation7]  }
  0x30   : > { %s1165_s10 = sshll.u32 %s1653_s27, 8  ;;  %s250_s29 = scalar_lea.vmem [#allocation3], %s1130_s21 }
  0x31   : > { %s257_s9 = sshll.u32 %s250_s29, 4  ;;  %s1805_s30 = scalar_lea.hbm %s2264_s0, %s1165_s10  ;;  %s1807_s9 = int_to_ptr.vmem [resolvable:$true] %s257_s9 }
  0x32   : > { %s1809_s18 = scalar_lea.sflag [#allocation4], %s246_s19  ;;  %s1553_s11 = scalar_lea.hbm %s1805_s30, 256 }
  0x33   : > { %p1554_p6 = scmp.ne.s32.totalorder %s1805_s30, %s1553_s11  ;;  %p2291_p11 = scmp.ne.s32.totalorder %s2290_s20, 0 }
  0x34   : > { %s1558_s21 = scalar_lea.hbm %s2264_s0, 512  ;;  %p1559_p7 = scmp.lt.u32.totalorder %s1805_s30, %s2264_s0 }
  0x35   : > { %p1555_p12 = pneg %p2291_p11  ;;  %p1560_p3 = scmp.lt.u32.totalorder %s1558_s21, %s1553_s11 }
  0x36   : > { %p1562_p9 = scmp.lt.u32.totalorder %s1553_s11, %s1805_s30 }
  0x37   : > { %p1556_p13 = pnand %p1555_p12, %p1554_p6  ;;  %p1561_p8 = por %p1560_p3, %p1559_p7 }
  0x39   : > { %p1557_p1 = pneg %p1556_p13  ;;  %p1563_p10 = por %p1562_p9, %p1561_p8 }
  0x3b   : > { %p1564_p2 = pnand %p1563_p10, %p1557_p1 }
  0x3d   : > { %1567 = shalt.err (!%p1564_p2)
}
  0x3e   : > { %s1568_s19 = scalar_lea.vmem %s1807_s9, 256  ;;  %s1656_s8 = smov [#allocation3]  }
  0x3f   : > { %p1569_p4 = scmp.ne.s32.totalorder %s1807_s9, %s1568_s19  ;;  %s1573_s10 = sshll.u32 %s1656_s8, 4  ;;  %s1574_s10 = int_to_ptr.vmem [resolvable:$false] %s1573_s10 }
  0x40   : > { %s1575_s29 = scalar_lea.vmem %s1574_s10, 512  ;;  %p1576_p6 = scmp.lt.s32.totalorder %s1807_s9, %s1574_s10 }
  0x41   : > { %p1571_p5 = pnand %p1569_p4, %p1555_p12  ;;  %p1577_p13 = scmp.lt.s32.totalorder %s1575_s29, %s1568_s19 }
  0x43   : > { %p1572_p0 = pneg %p1571_p5  ;;  %p1578_p7 = por %p1577_p13, %p1576_p6 }
  0x45   : > { %p1579_p3 = pnand %p1578_p7, %p1572_p0 }
  0x47   : > { %1582 = shalt.err (!%p1579_p3)
}
  0x48   : > { %s1657_s16 = smov 128   ;;  %s1658_s11 = smov 8  }
  0x49   : > { %1429 = dma.hbm_to_vmem [thread:$0]  (!%p2291_p11), %s1805_s30, 256, %s1807_s9, %s1809_s18, %s1657_s16, %s1657_s16, %s1658_s11  }
  0x4a   : > { %p2292_p12 = scmp.ne.s32.totalorder %s2287_s15, 0 }
  0x4b   : > { %s1840_s17 = sand.u32 (!%p2292_p12), 1, %s1645_s25   ;;  %p2293_p1 = scmp.ne.s32.totalorder (!%p2292_p12), %s2284_s12, 0 }
  0x4c   : > { %269 = sbr.rel (%p2292_p12) target bundleno = 1464 (0x5b8), region = 48  ;;  %s1134_s26 = sshll.u32 (!%p2292_p12), %s1840_s17, 4 }
  0x4d   : > { %s272_s21 = scalar_lea.sflag (!%p2292_p12), [#allocation4], %s1840_s17  ;;  %s1846_s22 = scalar_lea.vmem (!%p2292_p12), [#allocation3], %s1134_s26 }
  0x53   : > { %1628 = dma.done.wait (%p2293_p1), %s272_s21, 256  }
  0x54   : > { %1630 = vsyncadd (%p2293_p1), %s272_s21, 4294967040  ;;  %p2294_p11 = scmp.eq.s32.totalorder %s1725_s28, 0 }
  0x56   : > { %1632 = dma.done.wait (%p2294_p11), [#allocation7], 16   ;;  %p2295_p8 = pmov %p2294_p11 }
  0x57   : > { %v1659_v0 = vmov 0.0   ;;  %v313_v1 = vld [vmem:[%s2265_s1 + $0x8] sm:$0xff]  ;;  %v315_v2 = vld [vmem:[%s2265_s1 + $0x18] sm:$0xff]  ;;  %v312_v3 = vld [vmem:[%s2265_s1] sm:$0xff]  ;;  %s1660_s18 = smov 64   ;;  %vm340_vm0 = vcmask 523264   ;;  %v330_v48 = vlaneseq }
  0x58   : > { %1634 = vsyncadd (%p2295_p8), [#allocation7], 4294967280  ;;  %411 = vmatprep.mubr.f32.mxu0 %v1659_v0  ;;  %v1302_v4 = vpack.c.bf16 %v315_v2, %v313_v1  ;;  %v314_v5 = vld [vmem:[%s2265_s1 + $0x10] sm:$0xff]  ;;  %v317_v6 = vld [vmem:[%s2265_s1 + $0x28] sm:$0xff]  ;;  %vm805_vm2 = vcmask 1048064   ;;  %s309_s9 = scalar_lea.vmem [#allocation8], %s1134_s26 }
  0x59   : > { %v319_v7 = vld [vmem:[%s2265_s1 + $0x38] sm:$0xff]  ;;  %v1304_v8 = vpack.c.bf16 %v314_v5, %v312_v3  ;;  %v316_v10 = vld [vmem:[%s2265_s1 + $0x20] sm:$0xff]  ;;  %v318_v11 = vld [vmem:[%s2265_s1 + $0x30] sm:$0xff]  ;;  %v331_v50 = vshrl.u32 %v330_v48, 7  ;;  %s1043_s23 = sshll.u32 %s309_s9, 4  ;;  %s1166_s12 = sshll.u32 %s1725_s28, 8  ;;  %s2213_s23 = int_to_ptr.vmem [resolvable:$true] %s1043_s23 }
  0x5a   : > { %v1306_v9 = vpack.c.bf16 %v319_v7, %v317_v6  ;;  %v321_v12 = vld [vmem:[%s2265_s1 + $0x48] sm:$0xff]  ;;  %1303 = vmatprep.subr.bf16.mxu0 %v1302_v4  ;;  %v323_v13 = vld [vmem:[%s2265_s1 + $0x58] sm:$0xff]  ;;  %v1308_v14 = vpack.c.bf16 %v318_v11, %v316_v10  ;;  %v320_v16 = vld [vmem:[%s2265_s1 + $0x40] sm:$0xff]  ;;  %s2218_s8 = scalar_lea.hbm %s2271_s7, %s1166_s12  ;;  %s1030_s26 = scalar_lea.sflag [#allocation5], %s1840_s17 }
  0x5b   : > { %1305 = vmatpush1.bf16.msra.mxu0 %v1304_v8  ;;  %v1310_v15 = vpack.c.bf16 %v323_v13, %v321_v12  ;;  %v322_v17 = vld [vmem:[%s2265_s1 + $0x50] sm:$0xff]  ;;  %v325_v18 = vld [vmem:[%s2265_s1 + $0x68] sm:$0xff]  ;;  %v327_v19 = vld [vmem:[%s2265_s1 + $0x78] sm:$0xff]  ;;  %v332_v53 = vsub.s32 0, %v331_v50  ;;  %v336_v55 = vsub.s32 1, %v331_v50  ;;  %s1583_s28 = scalar_lea.vmem %s2213_s23, 256 }
  0x5c   : > { %1307 = vmatprep.subr.bf16.mxu0 %v1306_v9  ;;  %v1901_v20 = vld [vmem:[%s2270_s6] sm:$0xff]  ;;  %v1906_v21 = vld [vmem:[%s2270_s6 + $0x10] sm:$0xff]  ;;  %v1312_v22 = vpack.c.bf16 %v322_v17, %v320_v16  ;;  %v1915_v23 = vld [vmem:[%s2270_s6 + $0x8] sm:$0xff]  ;;  %v1314_v25 = vpack.c.bf16 %v327_v19, %v325_v18  ;;  %p1584_p9 = scmp.ne.s32.totalorder %s2213_s23, %s1583_s28  ;;  %p2298_p10 = scmp.ne.s32.totalorder %s2285_s13, 0 }
  0x5d   : > { %456 = vrot.lane.b32.xlu0 %v1901_v20, %s1660_s18  ;;  %460 = vrot.lane.b32.xlu1 %v1906_v21, %s1660_s18  ;;  %v1920_v24 = vld [vmem:[%s2270_s6 + $0x18] sm:$0xff]  ;;  %v324_v26 = vld [vmem:[%s2265_s1 + $0x60] sm:$0xff]  ;;  %vm2118_vm1 = vmpackc.low %vm340_vm0, %vm340_vm0  ;;  %s1661_s10 = smov [#allocation8]  }
  0x5e   : > { %v326_v27 = vld [vmem:[%s2265_s1 + $0x70] sm:$0xff]  ;;  %v1935_v29 = vld [vmem:[%s2270_s6 + $0x20] sm:$0xff]  ;;  %v1940_v30 = vld [vmem:[%s2270_s6 + $0x28] sm:$0xff]  ;;  %p1585_p2 = pnand %p1584_p9, %p2298_p10  ;;  %s1587_s29 = sshll.u32 %s1661_s10, 4  ;;  %s1588_s29 = int_to_ptr.vmem [resolvable:$false] %s1587_s29 }
  0x5f   : > { %1309 = vmatpush1.bf16.msra.mxu0 %v1308_v14  ;;  %v1316_v28 = vpack.c.bf16 %v326_v27, %v324_v26  ;;  %v310_v31 = vld [vmem:[%s1846_s22] sm:$0xff]  ;;  %v1955_v33 = vld [vmem:[%s2270_s6 + $0x38] sm:$0xff]  ;;  %v1971_v36 = vld [vmem:[%s2270_s6 + $0x48] sm:$0xff]  ;;  %s1589_s16 = scalar_lea.vmem %s1588_s29, 512  ;;  %p1590_p5 = scmp.lt.s32.totalorder %s2213_s23, %s1588_s29 }
  0x60   : > { %1311 = vmatprep.subr.bf16.mxu0 %v1310_v15  ;;  %v1950_v32 = vld [vmem:[%s2270_s6 + $0x30] sm:$0xff]  ;;  %v311_v34 = vld [vmem:[%s1846_s22 + $0x8] sm:$0xff]  ;;  %v1966_v35 = vld [vmem:[%s2270_s6 + $0x40] sm:$0xff]  ;;  %p1586_p4 = pneg %p1585_p2  ;;  %p1591_p0 = scmp.lt.s32.totalorder %s1589_s16, %s1583_s28 }
  0x61   : > { %458 = vrot.lane.b32.xlu0 %v1915_v23, %s1660_s18  ;;  %462 = vrot.lane.b32.xlu1 %v1920_v24, %s1660_s18  ;;  %v1981_v37 = vld [vmem:[%s2270_s6 + $0x50] sm:$0xff]  ;;  %v1986_v38 = vld [vmem:[%s2270_s6 + $0x58] sm:$0xff] }
  0x62   : > { %v1995_v39 = vld [vmem:[%s2270_s6 + $0x60] sm:$0xff]  ;;  %v2000_v40 = vld [vmem:[%s2270_s6 + $0x68] sm:$0xff]  ;;  %v2009_v41 = vld [vmem:[%s2270_s6 + $0x70] sm:$0xff]  ;;  %p1592_p6 = por %p1591_p0, %p1590_p5 }
  0x63   : > { %1313 = vmatpush1.bf16.msra.mxu0 %v1312_v22  ;;  %v2014_v42 = vld [vmem:[%s2270_s6 + $0x78] sm:$0xff]  ;;  %v328_v54 = vld [vmem:[%s2266_s2] sm:$0x3] }
  0x64   : > { %1315 = vmatprep.subr.bf16.mxu0 %v1314_v25  ;;  %v333_v57 = vrot.slane %v328_v54, %v332_v53  ;;  %v337_v59 = vrot.slane %v328_v54, %v336_v55  ;;  %p1593_p13 = pnand %p1592_p6, %p1586_p4 }
  0x65   : > { %464 = vrot.lane.b32.xlu0 %v1935_v29, %s1660_s18  ;;  %466 = vrot.lane.b32.xlu1 %v1940_v30, %s1660_s18 }
  0x67   : > { %1317 = vmatpush1.bf16.msra.mxu0 %v1316_v28 }
  0x69   : > { %468 = vrot.lane.b32.xlu0 %v1950_v32, %s1660_s18  ;;  %470 = vrot.lane.b32.xlu1 %v1955_v33, %s1660_s18 }
  0x6a   : > { %1137 = vmatmul.mubr.msk.f32.vlgmr.msra.gmra.mrb[0].mxu0 %vm340_vm0, %v310_v31 }
  0x6b   : > { %417 = vmatprep.mubr.f32.mxu0 %v1659_v0 }
  0x6d   : > { %472 = vrot.lane.b32.xlu0 %v1966_v35, %s1660_s18  ;;  %474 = vrot.lane.b32.xlu1 %v1971_v36, %s1660_s18 }
  0x6e   : > { %1138 = vmatmul.mubr.msk.f32.gmra.mrb[2].mxu0 %vm340_vm0, %v311_v34 }
  0x71   : > { %476 = vrot.lane.b32.xlu0 %v1981_v37, %s1660_s18  ;;  %478 = vrot.lane.b32.xlu1 %v1986_v38, %s1660_s18 }
  0x75   : > { %480 = vrot.lane.b32.xlu0 %v1995_v39, %s1660_s18  ;;  %482 = vrot.lane.b32.xlu1 %v2000_v40, %s1660_s18 }
  0x79   : > { %484 = vrot.lane.b32.xlu0 %v2009_v41, %s1660_s18  ;;  %486 = vrot.lane.b32.xlu1 %v2014_v42, %s1660_s18 }
  0xcf   : > { %v461_v43 = vpop.permute.xlu1 %460  ;;  %v457_v44 = vpop.permute.xlu0 %456 }
  0xd3   : > { %v463_v45 = vpop.permute.xlu1 %462  ;;  %v459_v46 = vpop.permute.xlu0 %458 }
  0xd7   : > { %v467_v47 = vpop.permute.xlu1 %466  ;;  %v465_v49 = vpop.permute.xlu0 %464 }
  0xdb   : > { %v471_v51 = vpop.permute.xlu1 %470  ;;  %v469_v52 = vpop.permute.xlu0 %468 }
  0xdf   : > { %v475_v56 = vpop.permute.xlu1 %474  ;;  %v2023_v58 = vpop.permute.xlu0 %472 }
  0xe3   : > { %v479_v63 = vpop.permute.xlu1 %478  ;;  %v477_v1 = vpop.permute.xlu0 %476 }
  0xe7   : > { %v483_v17 = vpop.permute.xlu1 %482  ;;  %v481_v26 = vpop.permute.xlu0 %480 }
  0xeb   : > { %v487_v54 = vpop.permute.xlu1 %486 }
 0x13d   : > { %v413_v60 = vpop.f32.mrb[0].mxu0 }
 0x13e   : > { %v2025_v61 = vadd.f32 %v413_v60, %v333_v57  ;;  %v415_v62 = vpop.f32.mrb[1].mxu0 }
 0x13f   : > { %v416_v0 = vadd.f32 %v415_v62, %v337_v59 }
 0x140   : > { %1245 = vmatprep.mubr.msk.f32.mxu1 %vm340_vm0, %v2025_v61  ;;  %v506_v3 = vmul.f32 %v461_v43, %v2025_v61  ;;  %v504_v9 = vmul.f32 %v457_v44, %v2025_v61  ;;  %v510_v18 = vmul.f32 %v469_v52, %v2025_v61  ;;  %v508_v28 = vmul.f32 %v465_v49, %v2025_v61 }
 0x141   : > { %v419_v2 = vpop.f32.mrb[2].mxu0  ;;  %v693_v6 = vmul.f32 %v1901_v20, %v416_v0  ;;  %v695_v7 = vmul.f32 %v1906_v21, %v416_v0  ;;  %v699_v8 = vmul.f32 %v1950_v32, %v416_v0  ;;  %v697_v10 = vmul.f32 %v1935_v29, %v416_v0 }
 0x142   : > { %v2030_v4 = vadd.f32 %v419_v2, %v333_v57  ;;  %v421_v5 = vpop.f32.mrb[3].mxu0  ;;  %v701_v11 = vmul.f32 %v1966_v35, %v416_v0  ;;  %v703_v12 = vmul.f32 %v1981_v37, %v416_v0  ;;  %v707_v53 = vmul.f32 %v2009_v41, %v416_v0  ;;  %v485_v57 = vpop.permute.xlu0 %484 }
 0x143   : > { %v422_v13 = vadd.f32 %v421_v5, %v337_v59  ;;  %709 = vst.msk [vmem:[#allocation2] sm:$0xff] %vm340_vm0, %v693_v6  ;;  %711 = vst.msk [vmem:[#allocation2 + $0x10] sm:$0xff] %vm340_vm0, %v695_v7  ;;  %v514_v55 = vmul.f32 %v477_v1, %v2025_v61 }
 0x144   : > { %v507_v14 = vmul.f32 %v463_v45, %v2030_v4  ;;  %v505_v15 = vmul.f32 %v459_v46, %v2030_v4  ;;  %v511_v16 = vmul.f32 %v471_v51, %v2030_v4  ;;  %715 = vst.msk [vmem:[#allocation2 + $0x30] sm:$0xff] %vm340_vm0, %v699_v8  ;;  %713 = vst.msk [vmem:[#allocation2 + $0x20] sm:$0xff] %vm340_vm0, %v697_v10 }
 0x145   : > { %717 = vst.msk [vmem:[#allocation2 + $0x40] sm:$0xff] %vm340_vm0, %v701_v11  ;;  %719 = vst.msk [vmem:[#allocation2 + $0x50] sm:$0xff] %vm340_vm0, %v703_v12  ;;  %v509_v25 = vmul.f32 %v467_v47, %v2030_v4  ;;  %v515_v31 = vmul.f32 %v479_v63, %v2030_v4  ;;  %v513_v34 = vmul.f32 %v475_v56, %v2030_v4 }
 0x146   : > { %v1482_v19 = vpack.i.bf16 %v507_v14, %v506_v3  ;;  %v1477_v22 = vpack.i.bf16 %v505_v15, %v504_v9  ;;  %v1492_v27 = vpack.i.bf16 %v511_v16, %v510_v18  ;;  %v694_v43 = vmul.f32 %v1915_v23, %v422_v13  ;;  %723 = vst.msk [vmem:[#allocation2 + $0x70] sm:$0xff] %vm340_vm0, %v707_v53 }
 0x147   : > { %v696_v44 = vmul.f32 %v1920_v24, %v422_v13  ;;  %v698_v45 = vmul.f32 %v1940_v30, %v422_v13  ;;  %v700_v46 = vmul.f32 %v1955_v33, %v422_v13  ;;  %v702_v47 = vmul.f32 %v1971_v36, %v422_v13 }
 0x148   : > { %1483 = vrot.lane.b32.xlu1 %v1482_v19, %s1660_s18  ;;  %1478 = vrot.lane.b32.xlu0 %v1477_v22, %s1660_s18  ;;  %v704_v48 = vmul.f32 %v1986_v38, %v422_v13  ;;  %v706_v49 = vmul.f32 %v2000_v40, %v422_v13  ;;  %v1487_v50 = vpack.i.bf16 %v509_v25, %v508_v28 }
 0x149   : > { %710 = vst.msk [vmem:[#allocation2 + $0x8] sm:$0xff] %vm340_vm0, %v694_v43  ;;  %712 = vst.msk [vmem:[#allocation2 + $0x18] sm:$0xff] %vm340_vm0, %v696_v44  ;;  %v705_v51 = vmul.f32 %v1995_v39, %v416_v0  ;;  %v708_v52 = vmul.f32 %v2014_v42, %v422_v13  ;;  %v512_v56 = vmul.f32 %v2023_v58, %v2025_v61 }
 0x14a   : > { %714 = vst.msk [vmem:[#allocation2 + $0x28] sm:$0xff] %vm340_vm0, %v698_v45  ;;  %716 = vst.msk [vmem:[#allocation2 + $0x38] sm:$0xff] %vm340_vm0, %v700_v46  ;;  %v519_v59 = vmul.f32 %v487_v54, %v2030_v4  ;;  %v1502_v60 = vpack.i.bf16 %v515_v31, %v514_v55  ;;  %v517_v63 = vmul.f32 %v483_v17, %v2030_v4 }
 0x14b   : > { %718 = vst.msk [vmem:[#allocation2 + $0x48] sm:$0xff] %vm340_vm0, %v702_v47  ;;  %720 = vst.msk [vmem:[#allocation2 + $0x58] sm:$0xff] %vm340_vm0, %v704_v48  ;;  %v1497_v62 = vpack.i.bf16 %v513_v34, %v512_v56  ;;  %v518_v0 = vmul.f32 %v485_v57, %v2025_v61  ;;  %v516_v58 = vmul.f32 %v481_v26, %v2025_v61 }
 0x14c   : > { %722 = vst.msk [vmem:[#allocation2 + $0x68] sm:$0xff] %vm340_vm0, %v706_v49  ;;  %1493 = vrot.lane.b32.xlu1 %v1492_v27, %s1660_s18  ;;  %1488 = vrot.lane.b32.xlu0 %v1487_v50, %s1660_s18  ;;  %721 = vst.msk [vmem:[#allocation2 + $0x60] sm:$0xff] %vm340_vm0, %v705_v51 }
 0x14d   : > { %724 = vst.msk [vmem:[#allocation2 + $0x78] sm:$0xff] %vm340_vm0, %v708_v52  ;;  %v1512_v1 = vpack.i.bf16 %v519_v59, %v518_v0  ;;  %v1507_v2 = vpack.i.bf16 %v517_v63, %v516_v58 }
 0x150   : > { %1503 = vrot.lane.b32.xlu1 %v1502_v60, %s1660_s18  ;;  %1498 = vrot.lane.b32.xlu0 %v1497_v62, %s1660_s18 }
 0x154   : > { %1513 = vrot.lane.b32.xlu1 %v1512_v1, %s1660_s18  ;;  %1508 = vrot.lane.b32.xlu0 %v1507_v2, %s1660_s18 }
 0x158   : > { %759 = vrot.lane.b32.xlu1 %v1915_v23, %s1660_s18  ;;  %757 = vrot.lane.b32.xlu0 %v1901_v20, %s1660_s18 }
 0x15c   : > { %763 = vrot.lane.b32.xlu1 %v1920_v24, %s1660_s18  ;;  %761 = vrot.lane.b32.xlu0 %v1906_v21, %s1660_s18 }
 0x160   : > { %767 = vrot.lane.b32.xlu1 %v1940_v30, %s1660_s18  ;;  %765 = vrot.lane.b32.xlu0 %v1935_v29, %s1660_s18 }
 0x164   : > { %769 = vrot.lane.b32.xlu1 %v1950_v32, %s1660_s18  ;;  %773 = vrot.lane.b32.xlu0 %v1966_v35, %s1660_s18  ;;  %v521_v32 = vld [vmem:[%s2269_s5 + $0x8] sm:$0xff] }
 0x168   : > { %771 = vrot.lane.b32.xlu1 %v1955_v33, %s1660_s18  ;;  %777 = vrot.lane.b32.xlu0 %v1981_v37, %s1660_s18 }
 0x16c   : > { %775 = vrot.lane.b32.xlu1 %v1971_v36, %s1660_s18  ;;  %779 = vrot.lane.b32.xlu0 %v1986_v38, %s1660_s18 }
 0x170   : > { %783 = vrot.lane.b32.xlu1 %v2000_v40, %s1660_s18  ;;  %781 = vrot.lane.b32.xlu0 %v1995_v39, %s1660_s18 }
 0x1ba   : > { %v1484_v20 = vpop.permute.xlu1 %1483  ;;  %v1479_v21 = vpop.permute.xlu0 %1478 }
 0x1bb   : > { %v1486_v23 = vunpack.i.h.bf16 %v1484_v20  ;;  %v1485_v24 = vunpack.i.l.bf16 %v1484_v20  ;;  %v1481_v29 = vunpack.i.h.bf16 %v1479_v21  ;;  %v1480_v30 = vunpack.i.l.bf16 %v1479_v21 }
 0x1bd   : > { %v1318_v33 = vpack.c.bf16 %v1481_v29, %v1480_v30  ;;  %v1324_v35 = vpack.c.bf16 %v1486_v23, %v1485_v24 }
 0x1be   : > { %v1489_v36 = vpop.permute.xlu0 %1488  ;;  %v1494_v40 = vpop.permute.xlu1 %1493 }
 0x1bf   : > { %1320 = vmatprep.subr.msk.bf16.mxu1 %vm2118_vm1, %v1318_v33  ;;  %v1491_v37 = vunpack.i.h.bf16 %v1489_v36  ;;  %v1490_v38 = vunpack.i.l.bf16 %v1489_v36  ;;  %v1496_v61 = vunpack.i.h.bf16 %v1494_v40  ;;  %v1495_v3 = vunpack.i.l.bf16 %v1494_v40 }
 0x1c0   : > { %1323 = vmatpush3.bf16.xpose.msk.msra.mxu1 %vm2118_vm1, %v1318_v33  ;;  %v520_v33 = vld [vmem:[%s2269_s5] sm:$0xff] }
 0x1c1   : > { %1326 = vmatprep.subr.msk.bf16.mxu1 %vm2118_vm1, %v1324_v35  ;;  %v1330_v39 = vpack.c.bf16 %v1491_v37, %v1490_v38  ;;  %v1336_v5 = vpack.c.bf16 %v1496_v61, %v1495_v3 }
 0x1c2   : > { %v1499_v6 = vpop.permute.xlu0 %1498  ;;  %v1504_v10 = vpop.permute.xlu1 %1503 }
 0x1c3   : > { %v1501_v7 = vunpack.i.h.bf16 %v1499_v6  ;;  %v1500_v8 = vunpack.i.l.bf16 %v1499_v6  ;;  %v1506_v11 = vunpack.i.h.bf16 %v1504_v10  ;;  %v1505_v12 = vunpack.i.l.bf16 %v1504_v10 }
 0x1c5   : > { %v1342_v9 = vpack.c.bf16 %v1501_v7, %v1500_v8  ;;  %v1348_v13 = vpack.c.bf16 %v1506_v11, %v1505_v12  ;;  %v931_v12 = vld [vmem:[%s2267_s3] sm:$0xff] }
 0x1c6   : > { %v1509_v14 = vpop.permute.xlu0 %1508  ;;  %v1514_v18 = vpop.permute.xlu1 %1513 }
 0x1c7   : > { %v1511_v15 = vunpack.i.h.bf16 %v1509_v14  ;;  %v1510_v16 = vunpack.i.l.bf16 %v1509_v14  ;;  %v1516_v19 = vunpack.i.h.bf16 %v1514_v18  ;;  %v1515_v22 = vunpack.i.l.bf16 %v1514_v18  ;;  %v933_v14 = vld [vmem:[%s2267_s3 + $0x10] sm:$0xff]  ;;  %v935_v18 = vld [vmem:[%s2267_s3 + $0x20] sm:$0xff] }
 0x1c8   : > { %1329 = vmatpush3.bf16.xpose.msk.msra.mxu1 %vm2118_vm1, %v1324_v35 }
 0x1c9   : > { %1332 = vmatprep.subr.msk.bf16.mxu1 %vm2118_vm1, %v1330_v39  ;;  %v1354_v17 = vpack.c.bf16 %v1511_v15, %v1510_v16  ;;  %v1360_v25 = vpack.c.bf16 %v1516_v19, %v1515_v22  ;;  %v934_v16 = vld [vmem:[%s2267_s3 + $0x18] sm:$0xff]  ;;  %v936_v19 = vld [vmem:[%s2267_s3 + $0x28] sm:$0xff] }
 0x1ca   : > { %v760_v26 = vpop.permute.xlu1 %759  ;;  %v758_v27 = vpop.permute.xlu0 %757  ;;  %v1406_v22 = vpack.c.bf16 %v936_v19, %v935_v18 }
 0x1cb   : > { %807 = vst.msk [vmem:[#allocation2 + $0x8] sm:$0xff] %vm805_vm2, %v760_v26  ;;  %806 = vst.msk [vmem:[#allocation2] sm:$0xff] %vm805_vm2, %v758_v27  ;;  %v937_v27 = vld [vmem:[%s2267_s3 + $0x30] sm:$0xff] }
 0x1ce   : > { %v764_v28 = vpop.permute.xlu1 %763  ;;  %v762_v31 = vpop.permute.xlu0 %761 }
 0x1cf   : > { %809 = vst.msk [vmem:[#allocation2 + $0x18] sm:$0xff] %vm805_vm2, %v764_v28  ;;  %808 = vst.msk [vmem:[#allocation2 + $0x10] sm:$0xff] %vm805_vm2, %v762_v31  ;;  %v938_v28 = vld [vmem:[%s2267_s3 + $0x38] sm:$0xff] }
 0x1d0   : > { %1335 = vmatpush3.bf16.xpose.msk.msra.mxu1 %vm2118_vm1, %v1330_v39  ;;  %v1410_v31 = vpack.c.bf16 %v938_v28, %v937_v27 }
 0x1d1   : > { %1338 = vmatprep.subr.msk.bf16.mxu1 %vm2118_vm1, %v1336_v5 }
 0x1d2   : > { %v768_v34 = vpop.permute.xlu1 %767  ;;  %v766_v43 = vpop.permute.xlu0 %765  ;;  %v822_v44 = vld [vmem:[#allocation2] sm:$0xff]  ;;  %v823_v45 = vld [vmem:[#allocation2 + $0x8] sm:$0xff] }
 0x1d3   : > { %811 = vst.msk [vmem:[#allocation2 + $0x28] sm:$0xff] %vm805_vm2, %v768_v34  ;;  %810 = vst.msk [vmem:[#allocation2 + $0x20] sm:$0xff] %vm805_vm2, %v766_v43 }
 0x1d6   : > { %v770_v46 = vpop.permute.xlu1 %769  ;;  %v774_v47 = vpop.permute.xlu0 %773  ;;  %v824_v48 = vld [vmem:[#allocation2 + $0x10] sm:$0xff]  ;;  %v825_v49 = vld [vmem:[#allocation2 + $0x18] sm:$0xff] }
 0x1d7   : > { %812 = vst.msk [vmem:[#allocation2 + $0x30] sm:$0xff] %vm805_vm2, %v770_v46  ;;  %814 = vst.msk [vmem:[#allocation2 + $0x40] sm:$0xff] %vm805_vm2, %v774_v47  ;;  %v1370_v50 = vpack.c.bf16 %v825_v49, %v824_v48 }
 0x1d8   : > { %1341 = vmatpush3.bf16.xpose.msk.msra.mxu1 %vm2118_vm1, %v1336_v5 }
 0x1d9   : > { %1344 = vmatprep.subr.msk.bf16.mxu1 %vm2118_vm1, %v1342_v9 }
 0x1da   : > { %v772_v51 = vpop.permute.xlu1 %771  ;;  %v778_v52 = vpop.permute.xlu0 %777  ;;  %v826_v53 = vld [vmem:[#allocation2 + $0x20] sm:$0xff]  ;;  %v827_v54 = vld [vmem:[#allocation2 + $0x28] sm:$0xff] }
 0x1db   : > { %813 = vst.msk [vmem:[#allocation2 + $0x38] sm:$0xff] %vm805_vm2, %v772_v51  ;;  %816 = vst.msk [vmem:[#allocation2 + $0x50] sm:$0xff] %vm805_vm2, %v778_v52  ;;  %v1374_v55 = vpack.c.bf16 %v827_v54, %v826_v53  ;;  %v1157_v53 = vld [vmem:[#allocation6] ss:$0 sm:$0xff] }
 0x1de   : > { %v776_v56 = vpop.permute.xlu1 %775  ;;  %v780_v57 = vpop.permute.xlu0 %779  ;;  %v828_v59 = vld [vmem:[#allocation2 + $0x30] sm:$0xff]  ;;  %v830_v58 = vld [vmem:[#allocation2 + $0x40] sm:$0xff] }
 0x1df   : > { %815 = vst.msk [vmem:[#allocation2 + $0x48] sm:$0xff] %vm805_vm2, %v776_v56  ;;  %817 = vst.msk [vmem:[#allocation2 + $0x58] sm:$0xff] %vm805_vm2, %v780_v57 }
 0x1e0   : > { %1347 = vmatpush3.bf16.xpose.msk.msra.mxu1 %vm2118_vm1, %v1342_v9 }
 0x1e1   : > { %1350 = vmatprep.subr.msk.bf16.mxu1 %vm2118_vm1, %v1348_v13 }
 0x1e2   : > { %v829_v60 = vld [vmem:[#allocation2 + $0x38] sm:$0xff]  ;;  %v784_v62 = vpop.permute.xlu1 %783  ;;  %v782_v63 = vpop.permute.xlu0 %781  ;;  %v832_v1 = vld [vmem:[#allocation2 + $0x50] sm:$0xff] }
 0x1e3   : > { %v1378_v0 = vpack.c.bf16 %v829_v60, %v828_v59  ;;  %819 = vst.msk [vmem:[#allocation2 + $0x68] sm:$0xff] %vm805_vm2, %v784_v62  ;;  %818 = vst.msk [vmem:[#allocation2 + $0x60] sm:$0xff] %vm805_vm2, %v782_v63 }
 0x1e6   : > { %v831_v2 = vld [vmem:[#allocation2 + $0x48] sm:$0xff]  ;;  %v833_v20 = vld [vmem:[#allocation2 + $0x58] sm:$0xff] }
 0x1e7   : > { %v1382_v21 = vpack.c.bf16 %v831_v2, %v830_v58  ;;  %v1386_v23 = vpack.c.bf16 %v833_v20, %v832_v1 }
 0x1e8   : > { %1353 = vmatpush3.bf16.xpose.msk.msra.mxu1 %vm2118_vm1, %v1348_v13  ;;  %v932_v13 = vld [vmem:[%s2267_s3 + $0x8] sm:$0xff] }
 0x1e9   : > { %1356 = vmatprep.subr.msk.bf16.mxu1 %vm2118_vm1, %v1354_v17  ;;  %v1398_v15 = vpack.c.bf16 %v932_v13, %v931_v12 }
 0x1ea   : > { %v834_v24 = vld [vmem:[#allocation2 + $0x60] sm:$0xff]  ;;  %v835_v29 = vld [vmem:[#allocation2 + $0x68] sm:$0xff] }
 0x1eb   : > { %v1390_v30 = vpack.c.bf16 %v835_v29, %v834_v24 }
 0x1f0   : > { %1359 = vmatpush3.bf16.xpose.msk.msra.mxu1 %vm2118_vm1, %v1354_v17  ;;  %v1402_v17 = vpack.c.bf16 %v934_v16, %v933_v14 }
 0x1f1   : > { %1362 = vmatprep.subr.msk.bf16.mxu1 %vm2118_vm1, %v1360_v25 }
 0x1f8   : > { %1365 = vmatpush3.bf16.xpose.msk.msra.mxu1 %vm2118_vm1, %v1360_v25 }
 0x1ff   : > { %1246 = vmatmul.mubr.msk.f32.vlgmr.msra.gmra.mrb[0].mxu1 %vm340_vm0, %v2030_v4  ;;  %v1366_v4 = vpack.c.bf16 %v823_v45, %v822_v44 }
 0x201   : > { %1367 = vmatprep.subr.bf16.mxu0 %v1366_v4 }
 0x202   : > { %1369 = vmatpush3.bf16.msra.mxu0 %v1366_v4 }
 0x203   : > { %1371 = vmatprep.subr.bf16.mxu0 %v1370_v50 }
 0x206   : > { %1373 = vmatpush3.bf16.msra.mxu0 %v1370_v50 }
 0x207   : > { %1375 = vmatprep.subr.bf16.mxu0 %v1374_v55 }
 0x20a   : > { %1377 = vmatpush3.bf16.msra.mxu0 %v1374_v55 }
 0x20b   : > { %1379 = vmatprep.subr.bf16.mxu0 %v1378_v0 }
 0x20e   : > { %1381 = vmatpush3.bf16.msra.mxu0 %v1378_v0 }
 0x20f   : > { %1383 = vmatprep.subr.bf16.mxu0 %v1382_v21 }
 0x212   : > { %1385 = vmatpush3.bf16.msra.mxu0 %v1382_v21 }
 0x213   : > { %1387 = vmatprep.subr.bf16.mxu0 %v1386_v23 }
 0x216   : > { %1389 = vmatpush3.bf16.msra.mxu0 %v1386_v23 }
 0x217   : > { %1391 = vmatprep.subr.bf16.mxu0 %v1390_v30 }
 0x21a   : > { %1393 = vmatpush3.bf16.msra.mxu0 %v1390_v30 }
 0x2d2   : > { %v1247_v35 = vpop.f32.mrb[0].mxu1 }
 0x2d3   : > { %v680_v36 = vadd.f32 %v1247_v35, %v521_v32  ;;  %v674_v37 = vpop.f32.mrb[1].mxu1 }
 0x2d4   : > { %v675_v38 = vadd.f32 %v674_v37, %v520_v33 }
 0x2d5   : > { %685 = vmax.xlane.f32.xlu1 %v680_v36 }
 0x2d6   : > { %683 = vmax.xlane.f32.xlu0 %v675_v38 }
 0x2e6   : > { %787 = vrot.lane.b32.xlu1 %v2014_v42, %s1660_s18 }
 0x2ec   : > { %785 = vrot.lane.b32.xlu0 %v2009_v41, %s1660_s18 }
 0x362   : > { %v686_v39 = vpop.xlane.xlu1 %685 }
 0x363   : > { %v688_v40 = vsub.f32 %v680_v36, %v686_v39  ;;  %v684_v61 = vpop.xlane.xlu0 %683 }
 0x364   : > { %v687_v3 = vsub.f32 %v675_v38, %v684_v61 }
 0x365   : > { %v691_v7 = vmul.f32 1.442695, %v688_v40 }
 0x366   : > { %v689_v5 = vmul.f32 1.442695, %v687_v3  ;;  %v788_v6 = vpop.permute.xlu1 %787 }
 0x367   : > { %821 = vst.msk [vmem:[#allocation2 + $0x78] sm:$0xff] %vm805_vm2, %v788_v6  ;;  %v786_v8 = vpop.permute.xlu0 %785 }
 0x368   : > { %1517 = vpow2.f32 %v689_v5  ;;  %820 = vst.msk [vmem:[#allocation2 + $0x70] sm:$0xff] %vm805_vm2, %v786_v8 }
 0x369   : > { %1519 = vpow2.f32 %v691_v7 }
 0x36e   : > { %v837_v9 = vld [vmem:[#allocation2 + $0x78] sm:$0xff] }
 0x36f   : > { %v836_v10 = vld [vmem:[#allocation2 + $0x70] sm:$0xff] }
 0x370   : > { %v1394_v42 = vpack.c.bf16 %v837_v9, %v836_v10 }
 0x372   : > { %v1518_v11 = vpop.eup %1517  ;;  %1395 = vmatprep.subr.bf16.mxu0 %v1394_v42 }
 0x373   : > { %1397 = vmatpush3.bf16.msra.mxu0 %v1394_v42  ;;  %1280 = vmatprep.mubr.f32.mxu0 %v1518_v11  ;;  %v1520_v41 = vpop.eup %1519 }
 0x374   : > { %1399 = vmatprep.subr.bf16.mxu0 %v1398_v15 }
 0x376   : > { %1281 = vmatmul.mubr.f32.vlgmr.msra.gmra.mrb[4].mxu0 %v1520_v41 }
 0x377   : > { %1401 = vmatpush3.bf16.msra.mxu0 %v1398_v15 }
 0x378   : > { %1403 = vmatprep.subr.bf16.mxu0 %v1402_v17 }
 0x37b   : > { %1405 = vmatpush3.bf16.msra.mxu0 %v1402_v17 }
 0x37c   : > { %1407 = vmatprep.subr.bf16.mxu0 %v1406_v22 }
 0x37f   : > { %1409 = vmatpush3.bf16.msra.mxu0 %v1406_v22 }
 0x380   : > { %1411 = vmatprep.subr.bf16.mxu0 %v1410_v31 }
 0x383   : > { %1413 = vmatpush3.bf16.msra.mxu0 %v1410_v31 }
 0x449   : > { %v1282_v25 = vpop.f32.mrb[4].mxu0 }
 0x44a   : > { %1521 = vrcp.f32 %v1282_v25  ;;  %v904_v26 = vpop.f32.mrb[5].mxu0 }
 0x44b   : > { %1523 = vrcp.f32 %v904_v26 }
 0x454   : > { %v1522_v34 = vpop.eup %1521 }
 0x455   : > { %v1524_v43 = vpop.eup %1523  ;;  %v916_v44 = vmul.f32 %v1522_v34, %v1282_v25 }
 0x456   : > { %v915_v45 = vmul.f32 %v1524_v43, %v904_v26 }
 0x457   : > { %v918_v4 = vsub.f32 2.0, %v916_v44 }
 0x458   : > { %v917_v46 = vsub.f32 2.0, %v915_v45 }
 0x459   : > { %v920_v47 = vmul.f32 %v1522_v34, %v918_v4 }
 0x45a   : > { %v919_v48 = vmul.f32 %v1524_v43, %v917_v46 }
 0x45b   : > { %925 = vrot.lane.b32.xlu1 %v920_v47, %s1660_s18 }
 0x45c   : > { %923 = vrot.lane.b32.xlu0 %v919_v48, %s1660_s18 }
 0x4cd   : > { %v926_v49 = vpop.permute.xlu1 %925 }
 0x4ce   : > { %v924_v50 = vpop.permute.xlu0 %923  ;;  %v930_v52 = vmul.f32 %v1282_v25, %v926_v49 }
 0x4cf   : > { %v929_v51 = vmul.f32 %v924_v50, %v904_v26 }
 0x4d1   : > { %1299 = vmatprep.mubr.msk.f32.mxu0 %vm340_vm0, %v929_v51 }
 0x4d2   : > { %1300 = vmatmul.mubr.msk.f32.vlgmr.msra.gmra.mrb[6].mxu0 %vm340_vm0, %v930_v52 }
 0x5a5   : > { %v1301_v54 = vpop.f32.mrb[6].mxu0 }
 0x5a6   : > { %v1024_v55 = vadd.f32 %v1301_v54, %v1157_v53  ;;  %v1018_v56 = vpop.f32.mrb[7].mxu0 }
 0x5a7   : > { %v1019_v57 = vadd.f32 %v1157_v53, %v1018_v56 }
 0x5a8   : > { %1028 = vst.msk [vmem:[%s309_s9 + $0x8] sm:$0xff] %vm340_vm0, %v1024_v55 }
 0x5a9   : > { %1027 = vst.msk [vmem:[%s309_s9] sm:$0xff] %vm340_vm0, %v1019_v57 }
 0x5aa   : > { %1596 = shalt.err (!%p1593_p13)
}
 0x5ab   : > { %s1597_s22 = scalar_lea.hbm %s2218_s8, 256  ;;  %s1601_s30 = scalar_lea.hbm %s2271_s7, 512 }
 0x5ac   : > { %p1598_p7 = scmp.ne.s32.totalorder %s2218_s8, %s1597_s22  ;;  %p1602_p1 = scmp.lt.u32.totalorder %s2218_s8, %s2271_s7 }
 0x5ad   : > { %p1603_p11 = scmp.lt.u32.totalorder %s1601_s30, %s1597_s22  ;;  %p1605_p9 = scmp.lt.u32.totalorder %s1597_s22, %s2218_s8 }
 0x5ae   : > { %p1599_p3 = pnand %p1598_p7, %p2298_p10 }
 0x5af   : > { %p1604_p8 = por %p1603_p11, %p1602_p1 }
 0x5b0   : > { %p1600_p12 = pneg %p1599_p3 }
 0x5b1   : > { %p1606_p2 = por %p1605_p9, %p1604_p8 }
 0x5b3   : > { %p1607_p4 = pnand %p1606_p2, %p1600_p12 }
 0x5b5   : > { %1610 = shalt.err (!%p1607_p4)
}
 0x5b6   : > { %s1662_s9 = smov 128   ;;  %s1663_s12 = smov 8  }
 0x5b7   : > { %1420 = dma.vmem_to_hbm [thread:$0]  (%p2298_p10), %s2213_s23, 256, %s2218_s8, %s1030_s26, %s1662_s9, %s1662_s9, %s1663_s12  }
 0x5b8 PF: > { %s1058_s18 = sand.u32 1, %s1641_s24   ;;  %p2299_p5 = scmp.ne.s32.totalorder %s2286_s14, 0 }
 0x5b9   : > { %p2300_p0 = scmp.ge.s32.totalorder %s1653_s27, 2  ;;  %s1059_s19 = scalar_lea.sflag [#allocation5], %s1058_s18 }
 0x5bb   : > { %p1431_p6 = pnand %p2300_p0, %p2299_p5 }
 0x5bd   : > { %1636 = dma.done.wait (!%p1431_p6), %s1059_s19, 256  }
 0x5be   : > { %1638 = vsyncadd (!%p1431_p6), %s1059_s19, 4294967040  ;;  %s2301_s27 = sld [smem:[#allocation13_spill]]  ;;  %s2302_s28 = sld [smem:[#allocation12_spill]] }
 0x5bf   : > { %s2303_s26 = sld [smem:[#allocation14_spill]]  ;;  %s2304_s24 = smov %s1645_s25 }
 0x5c4   : > { %p21_p13 = scmp.ge.s32.totalorder %s2301_s27, 4   ;;  %s2305_s25 = smov %s2302_s28 }
 0x5c6   :  { %23 = sbr.rel (!%p21_p13) target bundleno = 6 (0x6), region = 97 }
 0x5cd   :  { %1064 = vsyncpa [#allocation4], 1 }
 0x5ce   :  { %1066 = vsyncpa [#allocation4 + $0x1], 1 }
 0x5cf   :  { %1067 = vsyncpa [#allocation7], 1 }
 0x5d0   :  { %1068 = vsyncpa [#allocation5], 1 }
 0x5d1   :  { %1070 = vsyncpa [#allocation5 + $0x1], 1 }

</bundles_post_ra>
